<compile_context>
chip_gen: v7x
topology: tpu7x:2x2x1
jax: 0.10.0
libtpu: 0.0.40
codegen_flags: <defaults>
</compile_context>

<pallas_src>
import jax
import jax.numpy as jnp
from jax.experimental import pallas as pl
from jax.experimental.pallas import tpu as pltpu


# ---------------------------------------------------------------------------
# Pallas kernel: fused Linear -> ReLU -> Linear -> ReLU -> Linear -> Sigmoid
# (BatchNorm already folded into the weights/biases in the wrapper.)
# Matmul operands are bf16; accumulation / bias / ReLU / sigmoid are f32.
# ---------------------------------------------------------------------------
def mlp_kernel(emb_ref, w1_ref, b1_ref, w2_ref, b2_ref, w3_ref, b3_ref, out_ref):
    # Layer 1: bf16 x bf16 -> f32 accumulate.
    h = jnp.dot(emb_ref[...], w1_ref[...], preferred_element_type=jnp.float32)
    h = jnp.maximum(h + b1_ref[...], 0.0)

    # Layer 2.
    h = jnp.dot(h.astype(jnp.bfloat16), w2_ref[...],
                preferred_element_type=jnp.float32)
    h = jnp.maximum(h + b2_ref[...], 0.0)

    # Layer 3 (+ sigmoid). w3 is lane-padded to a multiple of 128 so the matmul is
    # full-width; keep only the first out_size columns before the (cheap) elementwise
    # tail and the narrow store.
    h = jnp.dot(h.astype(jnp.bfloat16), w3_ref[...],
                preferred_element_type=jnp.float32)
    n_out = out_ref.shape[1]
    out_ref[...] = jax.nn.sigmoid(h[:, :n_out] + b3_ref[...])


# ---------------------------------------------------------------------------
# Helpers
# ---------------------------------------------------------------------------
def _round_up(n, m):
    return ((n + m - 1) // m) * m


def _pad2(a, rows, cols):
    return jnp.pad(a, ((0, rows - a.shape[0]), (0, cols - a.shape[1])))


# ---------------------------------------------------------------------------
# One-time parameter prep: fold eval-mode BN, pad weights, cast to bf16.
# (Hoisted out of the per-call forward -- invariant across calls.)
# ---------------------------------------------------------------------------
def prepare_params(params):
    emb = params["emb"].astype(jnp.bfloat16)              # (V, E)

    w1 = params["w1"] * params["s1"]                       # (IN, 64)
    b1 = params["b1"] * params["s1"] + params["t1"]        # (1, 64)
    w2 = params["w2"] * params["s2"]                       # (64, 16)
    b2 = params["b2"] * params["s2"] + params["t2"]        # (1, 16)
    w3, b3 = params["w3"], params["b3"]                    # (16, OUT), (1, OUT)

    in_dim = w1.shape[0]
    h1_p = _round_up(w1.shape[1], 128)
    h2_p = _round_up(w2.shape[1], 128)
    out_size = w3.shape[1]
    out_p = _round_up(out_size, 128)

    return dict(
        emb=emb,
        w1=_pad2(w1, in_dim, h1_p).astype(jnp.bfloat16),
        b1=_pad2(b1, 1, h1_p).astype(jnp.float32),
        w2=_pad2(w2, h1_p, h2_p).astype(jnp.bfloat16),
        b2=_pad2(b2, 1, h2_p).astype(jnp.float32),
        w3=_pad2(w3, h2_p, out_p).astype(jnp.bfloat16),
        b3=b3.astype(jnp.float32),                         # (1, OUT), unpadded
        out_size=out_size,
    )


# ---------------------------------------------------------------------------
# Forward wrapper
# ---------------------------------------------------------------------------
def sentiment_embedding_forward(x, prepped, *, block_b=1024):
    """x: (B, num_words) int token ids. Returns (B, output_size) float32.

    block_b: batch tile size. Sweep 512-2048 on v6e/v7x; ~512-1024 on v5e (16 MiB
    default scoped VMEM). It is rounded to a multiple of 16 sublanes (bf16 packing)
    and capped at ~ceil(B/2) so the grid has >=2 steps for the two v7x TensorCores.
    """
    assert x.ndim == 2
    B, W = x.shape

    emb = prepped["emb"]
    E = emb.shape[1]
    in_dim = W * E

    w1, b1 = prepped["w1"], prepped["b1"]
    w2, b2 = prepped["w2"], prepped["b2"]
    w3, b3 = prepped["w3"], prepped["b3"]
    out_size = prepped["out_size"]
    h1_p, h2_p, out_p = w1.shape[1], w2.shape[1], w3.shape[1]
    assert w1.shape[0] == in_dim, "prepared w1 does not match num_words*embedding_dim"

    # --- batch tiling: multiple of 16 sublanes (bf16), capped at ceil(B/2) ----
    SUB = 16
    block_b = max(SUB, (block_b // SUB) * SUB)
    tb_target = _round_up(max(1, -(-B // 2)), SUB)
    TB = min(block_b, tb_target)
    Bp = _round_up(B, TB)
    grid = (Bp // TB,)

    # --- gather in XLA: pad only the tiny id tensor, not the activations -------
    ids = x.astype(jnp.int32)
    if Bp != B:
        ids = jnp.pad(ids, ((0, Bp - B), (0, 0)))          # pad ids with token 0
    embeds = jnp.take(emb, ids, axis=0).reshape(Bp, in_dim)  # (Bp, W*E) bf16

    # --- VMEM budget from actual tile sizes (v7x: 64 MiB phys / 32 MiB default) --
    est = (2 * TB * in_dim * 2                              # activations, 2 buffers
           + 2 * TB * max(out_size, 128) * 4                # output tiles (lane-padded)
           + 2 * (in_dim * h1_p + h1_p * h2_p + h2_p * out_p) * 2   # weights
           + 2 * (h1_p + h2_p + out_size) * 8 * 4)          # biases (padded), 2 buffers
    vmem_limit = int(max(32 << 20, min(est + (8 << 20), 48 << 20)))

    out = pl.pallas_call(
        mlp_kernel,
        out_shape=jax.ShapeDtypeStruct((Bp, out_size), jnp.float32),
        grid_spec=pltpu.PrefetchScalarGridSpec(
            num_scalar_prefetch=0,
            grid=grid,
            in_specs=[
                # activations: blocked over batch (feature dim = full array dim)
                pl.BlockSpec((TB, in_dim), lambda i: (i, 0)),
                # weights / biases: constant block index -> stay VMEM-resident
                pl.BlockSpec((in_dim, h1_p), lambda i: (0, 0)),
                pl.BlockSpec((1, h1_p), lambda i: (0, 0)),
                pl.BlockSpec((h1_p, h2_p), lambda i: (0, 0)),
                pl.BlockSpec((1, h2_p), lambda i: (0, 0)),
                pl.BlockSpec((h2_p, out_p), lambda i: (0, 0)),
                pl.BlockSpec((1, out_size), lambda i: (0, 0)),
            ],
            # Narrow (unpadded) output: minimal HBM writeback bytes.
            out_specs=pl.BlockSpec((TB, out_size), lambda i: (i, 0)),
        ),
        compiler_params=pltpu.CompilerParams(
            dimension_semantics=("parallel",),
            vmem_limit_bytes=vmem_limit),
    )(embeds, w1, b1, w2, b2, w3, b3)

    # Strip batch padding.
    return out[:B]


# ---------------------------------------------------------------------------
# Pure-JAX reference (f32, BN unfolded) for a correctness check
# ---------------------------------------------------------------------------
def reference_forward(x, params):
    hp = jax.lax.Precision.HIGHEST
    B = x.shape[0]
    embeds = jnp.take(params["emb"], x.astype(jnp.int32), axis=0).reshape(B, -1)
    h = jnp.dot(embeds, params["w1"], precision=hp) + params["b1"]
    h = jnp.maximum(h * params["s1"] + params["t1"], 0.0)
    h = jnp.dot(h, params["w2"], precision=hp) + params["b2"]
    h = jnp.maximum(h * params["s2"] + params["t2"], 0.0)
    h = jnp.dot(h, params["w3"], precision=hp) + params["b3"]
    return jax.nn.sigmoid(h)


# ---------------------------------------------------------------------------
# Deterministic synthetic parameters (PyTorch-style uniform fan-in init)
# ---------------------------------------------------------------------------
def init_params(key, num_words, vocab_size, embedding_dim, output_size):
    ks = jax.random.split(key, 12)
    in1 = embedding_dim * num_words

    def lin(kw, kb, fan_in, fan_out):
        bound = 1.0 / jnp.sqrt(fan_in)
        w = jax.random.uniform(kw, (fan_in, fan_out), jnp.float32, -bound, bound)
        b = jax.random.uniform(kb, (1, fan_out), jnp.float32, -bound, bound)
        return w, b

    emb = jax.random.normal(ks[0], (vocab_size, embedding_dim), jnp.float32)
    w1, b1 = lin(ks[1], ks[2], in1, 64)
    w2, b2 = lin(ks[3], ks[4], 64, 16)
    w3, b3 = lin(ks[5], ks[6], 16, output_size)

    def bn_fold(kg, kb, n, eps=1e-5):
        gamma = 1.0 + 0.1 * jax.random.normal(kg, (1, n), jnp.float32)
        beta = 0.1 * jax.random.normal(kb, (1, n), jnp.float32)
        running_mean = jnp.zeros((1, n), jnp.float32)
        running_var = jnp.ones((1, n), jnp.float32)
        scale = gamma / jnp.sqrt(running_var + eps)
        shift = beta - running_mean * scale
        return scale, shift

    s1, t1 = bn_fold(ks[7], ks[8], 64)
    s2, t2 = bn_fold(ks[9], ks[10], 16)

    return dict(emb=emb, w1=w1, b1=b1, s1=s1, t1=t1,
                w2=w2, b2=b2, s2=s2, t2=t2, w3=w3, b3=b3)


if __name__ == "__main__":
    B, num_words, vocab_size, embedding_dim, output_size = 4, 8, 100, 32, 1

    key = jax.random.PRNGKey(0)
    kp, kx = jax.random.split(key)
    params = init_params(kp, num_words, vocab_size, embedding_dim, output_size)
    x = jax.random.randint(kx, (B, num_words), 0, vocab_size, dtype=jnp.int32)

    prepped = prepare_params(params)
    out = sentiment_embedding_forward(x, prepped)
    jax.block_until_ready(out)
    assert out.shape == (B, output_size) and out.dtype == jnp.float32

    # bf16 matmul operands (f32 accumulation) vs an f32 HIGHEST-precision reference:
    # expect ~1e-3 abs error on the sigmoid output; use a comfortably loose tolerance.
    ref = reference_forward(x, params)
    assert jnp.allclose(out, ref, atol=2e-2, rtol=2e-2), (out, ref)

    print("KERNEL_OK")
</pallas_src>

<mosaic_0001>
module attributes {stable_mosaic.version = 11 : i64} {
  func.func @mlp_kernel(%arg0: i32, %arg1: memref<16x256xbf16, #tpu.memory_space<vmem>>, %arg2: memref<256x128xbf16, #tpu.memory_space<vmem>>, %arg3: memref<1x128xf32, #tpu.memory_space<vmem>>, %arg4: memref<128x128xbf16, #tpu.memory_space<vmem>>, %arg5: memref<1x128xf32, #tpu.memory_space<vmem>>, %arg6: memref<128x128xbf16, #tpu.memory_space<vmem>>, %arg7: memref<1x1xf32, #tpu.memory_space<vmem>>, %arg8: memref<16x1xf32, #tpu.memory_space<vmem>>) attributes {dimension_semantics = [#tpu.dimension_semantics<parallel>], iteration_bounds = array<i64: 1>, scalar_prefetch = 0 : i64, scratch_operands = 0 : i64, tpu.core_type = #tpu.core_type<tc>, window_params = [{transform_indices = @transform_0, window_bounds = array<i64: 16, 256>}, {pipeline_mode = #tpu.pipeline_mode<synchronous>, transform_indices = @transform_1, window_bounds = array<i64: 256, 128>}, {pipeline_mode = #tpu.pipeline_mode<synchronous>, transform_indices = @transform_2, window_bounds = array<i64: 1, 128>}, {pipeline_mode = #tpu.pipeline_mode<synchronous>, transform_indices = @transform_3, window_bounds = array<i64: 128, 128>}, {pipeline_mode = #tpu.pipeline_mode<synchronous>, transform_indices = @transform_4, window_bounds = array<i64: 1, 128>}, {pipeline_mode = #tpu.pipeline_mode<synchronous>, transform_indices = @transform_5, window_bounds = array<i64: 128, 128>}, {pipeline_mode = #tpu.pipeline_mode<synchronous>, transform_indices = @transform_6, window_bounds = array<i64: 1, 1>}, {transform_indices = @transform_7, window_bounds = array<i64: 16, 1>}]} {
    %c0 = arith.constant 0 : index
    %c0_0 = arith.constant 0 : index
    %0 = vector.load %arg1[%c0, %c0_0] : memref<16x256xbf16, #tpu.memory_space<vmem>>, vector<16x256xbf16>
    %c0_1 = arith.constant 0 : index
    %c0_2 = arith.constant 0 : index
    %1 = vector.load %arg2[%c0_1, %c0_2] : memref<256x128xbf16, #tpu.memory_space<vmem>>, vector<256x128xbf16>
    %cst = arith.constant dense<0.000000e+00> : vector<16x128xf32>
    %2 = tpu.matmul %0, %1, %cst {dimension_numbers = #tpu.dot_dimension_numbers<[1], [0], [0], [1], [0, 0, 1, 1], [], []>} : vector<16x256xbf16>, vector<256x128xbf16>, vector<16x128xf32> -> vector<16x128xf32>
    %c0_3 = arith.constant 0 : index
    %c0_4 = arith.constant 0 : index
    %3 = vector.load %arg3[%c0_3, %c0_4] : memref<1x128xf32, #tpu.memory_space<vmem>>, vector<1x128xf32>
    %4 = vector.broadcast %3 : vector<1x128xf32> to vector<16x128xf32>
    %5 = arith.addf %2, %4 : vector<16x128xf32>
    %cst_5 = arith.constant 0.000000e+00 : f32
    %6 = vector.broadcast %cst_5 : f32 to vector<16x128xf32>
    %7 = arith.maximumf %5, %6 : vector<16x128xf32>
    %8 = arith.truncf %7 : vector<16x128xf32> to vector<16x128xbf16>
    %c0_6 = arith.constant 0 : index
    %c0_7 = arith.constant 0 : index
    %9 = vector.load %arg4[%c0_6, %c0_7] : memref<128x128xbf16, #tpu.memory_space<vmem>>, vector<128x128xbf16>
    %cst_8 = arith.constant dense<0.000000e+00> : vector<16x128xf32>
    %10 = tpu.matmul %8, %9, %cst_8 {dimension_numbers = #tpu.dot_dimension_numbers<[1], [0], [0], [1], [0, 0, 1, 1], [], []>} : vector<16x128xbf16>, vector<128x128xbf16>, vector<16x128xf32> -> vector<16x128xf32>
    %c0_9 = arith.constant 0 : index
    %c0_10 = arith.constant 0 : index
    %11 = vector.load %arg5[%c0_9, %c0_10] : memref<1x128xf32, #tpu.memory_space<vmem>>, vector<1x128xf32>
    %12 = vector.broadcast %11 : vector<1x128xf32> to vector<16x128xf32>
    %13 = arith.addf %10, %12 : vector<16x128xf32>
    %cst_11 = arith.constant 0.000000e+00 : f32
    %14 = vector.broadcast %cst_11 : f32 to vector<16x128xf32>
    %15 = arith.maximumf %13, %14 : vector<16x128xf32>
    %16 = arith.truncf %15 : vector<16x128xf32> to vector<16x128xbf16>
    %c0_12 = arith.constant 0 : index
    %c0_13 = arith.constant 0 : index
    %17 = vector.load %arg6[%c0_12, %c0_13] : memref<128x128xbf16, #tpu.memory_space<vmem>>, vector<128x128xbf16>
    %cst_14 = arith.constant dense<0.000000e+00> : vector<16x128xf32>
    %18 = tpu.matmul %16, %17, %cst_14 {dimension_numbers = #tpu.dot_dimension_numbers<[1], [0], [0], [1], [0, 0, 1, 1], [], []>} : vector<16x128xbf16>, vector<128x128xbf16>, vector<16x128xf32> -> vector<16x128xf32>
    %19 = vector.extract_strided_slice %18 {offsets = [0, 0], sizes = [16, 1], strides = [1, 1]} : vector<16x128xf32> to vector<16x1xf32>
    %c0_15 = arith.constant 0 : index
    %c0_16 = arith.constant 0 : index
    %20 = vector.load %arg7[%c0_15, %c0_16] : memref<1x1xf32, #tpu.memory_space<vmem>>, vector<1x1xf32>
    %21 = vector.broadcast %20 : vector<1x1xf32> to vector<16x1xf32>
    %22 = arith.addf %19, %21 : vector<16x1xf32>
    %23 = arith.negf %22 : vector<16x1xf32>
    %24 = math.exp %23 : vector<16x1xf32>
    %cst_17 = arith.constant 1.000000e+00 : f32
    %25 = vector.broadcast %cst_17 : f32 to vector<16x1xf32>
    %26 = arith.addf %25, %24 : vector<16x1xf32>
    %27 = arith.divf %25, %26 : vector<16x1xf32>
    %c0_18 = arith.constant 0 : index
    %c0_19 = arith.constant 0 : index
    %28 = vector.load %arg8[%c0_18, %c0_19] : memref<16x1xf32, #tpu.memory_space<vmem>>, vector<16x1xf32>
    tpu.vector_store %arg8[%c0_18, %c0_19], %27 {strides = array<i32>} : memref<16x1xf32, #tpu.memory_space<vmem>>, vector<16x1xf32>,
    return
  }
  func.func @transform_0(%arg0: i32) -> (i32, i32) {
    %c0_i32 = arith.constant 0 : i32
    %c0_i32_0 = arith.constant 0 : i32
    return %arg0, %c0_i32 : i32, i32
  }
  func.func @transform_1(%arg0: i32) -> (i32, i32) {
    %c0_i32 = arith.constant 0 : i32
    %c0_i32_0 = arith.constant 0 : i32
    %c0_i32_1 = arith.constant 0 : i32
    return %c0_i32, %c0_i32_0 : i32, i32
  }
  func.func @transform_2(%arg0: i32) -> (i32, i32) {
    %c0_i32 = arith.constant 0 : i32
    %c0_i32_0 = arith.constant 0 : i32
    %c0_i32_1 = arith.constant 0 : i32
    return %c0_i32, %c0_i32_0 : i32, i32
  }
  func.func @transform_3(%arg0: i32) -> (i32, i32) {
    %c0_i32 = arith.constant 0 : i32
    %c0_i32_0 = arith.constant 0 : i32
    %c0_i32_1 = arith.constant 0 : i32
    return %c0_i32, %c0_i32_0 : i32, i32
  }
  func.func @transform_4(%arg0: i32) -> (i32, i32) {
    %c0_i32 = arith.constant 0 : i32
    %c0_i32_0 = arith.constant 0 : i32
    %c0_i32_1 = arith.constant 0 : i32
    return %c0_i32, %c0_i32_0 : i32, i32
  }
  func.func @transform_5(%arg0: i32) -> (i32, i32) {
    %c0_i32 = arith.constant 0 : i32
    %c0_i32_0 = arith.constant 0 : i32
    %c0_i32_1 = arith.constant 0 : i32
    return %c0_i32, %c0_i32_0 : i32, i32
  }
  func.func @transform_6(%arg0: i32) -> (i32, i32) {
    %c0_i32 = arith.constant 0 : i32
    %c0_i32_0 = arith.constant 0 : i32
    %c0_i32_1 = arith.constant 0 : i32
    return %c0_i32, %c0_i32_0 : i32, i32
  }
  func.func @transform_7(%arg0: i32) -> (i32, i32) {
    %c0_i32 = arith.constant 0 : i32
    %c0_i32_0 = arith.constant 0 : i32
    return %arg0, %c0_i32 : i32, i32
  }
}

</mosaic_0001>

<bundles_post_ra>
// kernel: tpu_custom_call.1
= control target key start
LH: loop header
LB: loop body
LE: loop exit
PB: predicated region body
PF: predicated region fallthrough
CT: control target
= control target key end

     0   :  { %s939_s0 = inlined_call_operand.hbm [shape: bf16[16,256], index: 0, kind: input, shape index: {}]   ;;  %s940_s1 = inlined_call_operand.hbm [shape: bf16[256,128], index: 1, kind: input, shape index: {}]   ;;  %s941_s2 = inlined_call_operand.vmem [shape: f32[1,128], index: 2, kind: input, shape index: {}]   ;;  %s942_s3 = inlined_call_operand.hbm [shape: bf16[128,128], index: 3, kind: input, shape index: {}]   ;;  %s943_s4 = inlined_call_operand.vmem [shape: f32[1,128], index: 4, kind: input, shape index: {}]   ;;  %s944_s5 = inlined_call_operand.hbm [shape: bf16[128,128], index: 5, kind: input, shape index: {}]   ;;  %s945_s6 = inlined_call_operand.<no memory space> [shape: f32[1,1], index: 6, kind: input, shape index: {}]   ;;  %s946_s7 = inlined_call_operand.vmem [shape: f32[16,1], index: 7, kind: output, shape index: {}]  }
   0x1   :  { %v12_v0 = vstv %s945_s6 }
   0x2   :  { %13 = vst [vmem:[#allocation2] sm:$0x1] %v12_v0 }
   0x3   :  { %14 = vsyncpa [#allocation4], 0 }
   0x4   :  { %15 = vsyncpa [#allocation6], 0 }
   0x5   :  { %16 = vsyncpa [#allocation9], 0  ;;  %s792_s26 = smov [#allocation5]   ;;  %s698_s30 = scalar_lea.hbm %s940_s1, 2048 }
   0x6   :  { %s34_s27 = sshll.u32 %s792_s26, 4  ;;  %p699_p0 = scmp.ne.s32.totalorder %s940_s1, %s698_s30  ;;  %s35_s27 = int_to_ptr.vmem [resolvable:$true] %s34_s27 }
   0x7   :  { %p702_p1 = scmp.lt.u32.totalorder %s698_s30, %s940_s1 }
   0x9   :  { %p704_p2 = pnand %p702_p1, %p699_p0 }
   0xb   :  { %707 = shalt.err (!%p704_p2)
}
   0xc   :  { %s708_s6 = scalar_lea.vmem %s35_s27, 2048  ;;  %p713_p4 = scmp.lt.s32.totalorder %s35_s27, %s35_s27 }
   0xd   :  { %p709_p3 = scmp.ne.s32.totalorder %s35_s27, %s708_s6  ;;  %p714_p5 = scmp.lt.s32.totalorder %s708_s6, %s708_s6 }
   0xf   :  { %p715_p6 = por %p714_p5, %p713_p4 }
  0x11   :  { %p716_p7 = pnand %p715_p6, %p709_p3 }
  0x13   :  { %719 = shalt.err (!%p716_p7)
}
  0x14   :  { %s793_s12 = smov 64   ;;  %s794_s13 = smov 4  }
  0x15   :  { %40 = dma.hbm_to_vmem [thread:$0]  %s940_s1, 2048, %s35_s27, [#allocation6], %s793_s12, %s793_s12, %s794_s13  }
  0x16   :  { %s795_s16 = smov [#allocation3]   ;;  %s720_s20 = scalar_lea.hbm %s939_s0, 256 }
  0x17   :  { %s22_s17 = sshll.u32 %s795_s16, 4  ;;  %p721_p8 = scmp.ne.s32.totalorder %s939_s0, %s720_s20  ;;  %s23_s17 = int_to_ptr.vmem [resolvable:$true] %s22_s17 }
  0x18   :  { %p724_p9 = scmp.lt.u32.totalorder %s720_s20, %s939_s0 }
  0x1a   :  { %p726_p10 = pnand %p724_p9, %p721_p8 }
  0x1c   :  { %729 = shalt.err (!%p726_p10)
}
  0x1d   :  { %s730_s25 = scalar_lea.vmem %s23_s17, 256  ;;  %p735_p12 = scmp.lt.s32.totalorder %s23_s17, %s23_s17 }
  0x1e   :  { %p731_p11 = scmp.ne.s32.totalorder %s23_s17, %s730_s25  ;;  %p736_p13 = scmp.lt.s32.totalorder %s730_s25, %s730_s25 }
  0x20   :  { %p737_p0 = por %p736_p13, %p735_p12 }
  0x22   :  { %p738_p1 = pnand %p737_p0, %p731_p11 }
  0x24   :  { %741 = shalt.err (!%p738_p1)
}
  0x25   :  { %s796_s1 = smov 128   ;;  %s797_s26 = smov 8  }
  0x26   :  { %28 = dma.hbm_to_vmem [thread:$0]  %s939_s0, 256, %s23_s17, [#allocation4], %s796_s1, %s796_s1, %s797_s26  }
  0x27   :  { %s798_s29 = smov [#allocation7]   ;;  %s799_s8 = smov [#allocation8]  }
  0x28   :  { %s48_s30 = sshll.u32 %s798_s29, 4  ;;  %s62_s9 = sshll.u32 %s799_s8, 4  ;;  %s49_s30 = int_to_ptr.vmem [resolvable:$true] %s48_s30  ;;  %s872_s9 = int_to_ptr.vmem [resolvable:$true] %s62_s9 }
  0x29   :  { %s742_s6 = scalar_lea.hbm %s942_s3, 1024 }
  0x2a   :  { %p743_p2 = scmp.ne.s32.totalorder %s942_s3, %s742_s6  ;;  %p746_p3 = scmp.lt.u32.totalorder %s742_s6, %s942_s3 }
  0x2c   :  { %p748_p4 = pnand %p746_p3, %p743_p2 }
  0x2e   :  { %751 = shalt.err (!%p748_p4)
}
  0x2f   :  { %s752_s0 = scalar_lea.vmem %s49_s30, 1024  ;;  %p757_p6 = scmp.lt.s32.totalorder %s49_s30, %s49_s30 }
  0x30   :  { %p753_p5 = scmp.ne.s32.totalorder %s49_s30, %s752_s0  ;;  %p758_p7 = scmp.lt.s32.totalorder %s752_s0, %s752_s0 }
  0x32   :  { %p759_p8 = por %p758_p7, %p757_p6 }
  0x34   :  { %p760_p9 = pnand %p759_p8, %p753_p5 }
  0x36   :  { %763 = shalt.err (!%p760_p9)
}
  0x37   :  { %54 = dma.hbm_to_vmem [thread:$0]  %s942_s3, 1024, %s49_s30, [#allocation6], %s793_s12, %s793_s12, %s794_s13  }
  0x38   :  { %s764_s22 = scalar_lea.hbm %s944_s5, 1024 }
  0x39   :  { %p765_p10 = scmp.ne.s32.totalorder %s944_s5, %s764_s22  ;;  %p768_p11 = scmp.lt.u32.totalorder %s764_s22, %s944_s5 }
  0x3b   :  { %p770_p12 = pnand %p768_p11, %p765_p10 }
  0x3d   :  { %773 = shalt.err (!%p770_p12)
}
  0x3e   :  { %s774_s26 = scalar_lea.vmem %s872_s9, 1024  ;;  %p779_p0 = scmp.lt.s32.totalorder %s872_s9, %s872_s9 }
  0x3f   :  { %p775_p13 = scmp.ne.s32.totalorder %s872_s9, %s774_s26  ;;  %p780_p1 = scmp.lt.s32.totalorder %s774_s26, %s774_s26 }
  0x41   :  { %p781_p2 = por %p780_p1, %p779_p0 }
  0x43   :  { %p782_p3 = pnand %p781_p2, %p775_p13 }
  0x45   :  { %785 = shalt.err (!%p782_p3)
}
  0x46   :  { %68 = dma.hbm_to_vmem [thread:$0]  %s944_s5, 1024, %s872_s9, [#allocation9], %s793_s12, %s793_s12, %s794_s13  }
  0x47   :  { %786 = dma.done.wait [#allocation4], 256  }
  0x48   :  { %787 = vsyncadd [#allocation4], 4294967040 }
  0x49   :  { %788 = dma.done.wait [#allocation6], 3072  }
  0x4a   :  { %789 = vsyncadd [#allocation6], 4294964224 }
  0x4b   :  { %790 = dma.done.wait [#allocation9], 1024  }
  0x4c   :  { %791 = vsyncadd [#allocation9], 4294966272  ;;  %v800_v1 = vmov 0.0   ;;  %v655_v2 = vld [vmem:[#allocation5 + $0x40] sm:$0xff]   ;;  %v657_v4 = vld [vmem:[#allocation5 + $0x48] sm:$0xff]   ;;  %vm801_vm0 = vmmov 0  }
  0x4d   :  { %605 = vmatprep.subr.bf16.mxu1 %v800_v1  ;;  %v656_v3 = vld [vmem:[#allocation5] sm:$0xff]   ;;  %565 = vmatprep.subr.bf16.mxu0 %v655_v2  ;;  %v658_v5 = vld [vmem:[#allocation5 + $0x8] sm:$0xff]   ;;  %v659_v6 = vld [vmem:[#allocation5 + $0x50] sm:$0xff]   ;;  %vm516_vm1 = vcmask 7168  }
  0x4e   :  { %566 = vmatpush3.bf16.msra.mxu0 %v656_v3  ;;  %v660_v7 = vld [vmem:[#allocation5 + $0x10] sm:$0xff]   ;;  %v661_v8 = vld [vmem:[#allocation5 + $0x58] sm:$0xff]   ;;  %v663_v10 = vld [vmem:[#allocation5 + $0x60] sm:$0xff]   ;;  %621 = vmatprep.mubr.msk.bf16.mxu1 %vm801_vm0, %v800_v1 }
  0x4f   :  { %567 = vmatprep.subr.bf16.mxu0 %v657_v4  ;;  %v662_v9 = vld [vmem:[#allocation5 + $0x18] sm:$0xff]   ;;  %v664_v11 = vld [vmem:[#allocation5 + $0x20] sm:$0xff]   ;;  %v665_v12 = vld [vmem:[#allocation5 + $0x68] sm:$0xff]  }
  0x50   :  { %v666_v13 = vld [vmem:[#allocation5 + $0x28] sm:$0xff]   ;;  %v673_v14 = vld [vmem:[#allocation3 + $0x4] ss:$8 sps:$4 sm:$0xff]   ;;  %v674_v15 = vld [vmem:[#allocation7] sm:$0xff]  }
  0x51   :  { %v667_v16 = vld [vmem:[#allocation5 + $0x70] sm:$0xff]   ;;  %263 = vmatprep.mubr.bf16.mxu0 %v673_v14  ;;  %606 = vmatpush3.bf16.msra.mxu1 %v674_v15  ;;  %v675_v17 = vld [vmem:[#allocation7 + $0x8] sm:$0xff]   ;;  %v669_v19 = vld [vmem:[#allocation5 + $0x78] sm:$0xff]  }
  0x52   :  { %568 = vmatpush3.bf16.msra.mxu0 %v658_v5  ;;  %v668_v18 = vld [vmem:[#allocation5 + $0x30] sm:$0xff]   ;;  %607 = vmatprep.subr.bf16.mxu1 %v800_v1  ;;  %v670_v21 = vld [vmem:[#allocation5 + $0x38] sm:$0xff]   ;;  %v678_v24 = vld [vmem:[#allocation7 + $0x20] sm:$0xff]  }
  0x53   :  { %569 = vmatprep.subr.bf16.mxu0 %v659_v6  ;;  %v676_v20 = vld [vmem:[#allocation7 + $0x10] sm:$0xff]   ;;  %v677_v22 = vld [vmem:[#allocation7 + $0x18] sm:$0xff]   ;;  %v679_v25 = vld [vmem:[#allocation7 + $0x28] sm:$0xff]  }
  0x54   :  { %v671_v23 = vld [vmem:[#allocation3] ss:$8 sps:$4 sm:$0xff]   ;;  %v682_v28 = vld [vmem:[#allocation8] sm:$0xff]   ;;  %v683_v29 = vld [vmem:[#allocation8 + $0x8] sm:$0xff]  }
  0x55   :  { %608 = vmatpush3.bf16.msra.mxu1 %v675_v17  ;;  %v680_v26 = vld [vmem:[#allocation7 + $0x30] sm:$0xff]   ;;  %v681_v27 = vld [vmem:[#allocation7 + $0x38] sm:$0xff]   ;;  %v686_v32 = vld [vmem:[#allocation8 + $0x20] sm:$0xff]  }
  0x56   :  { %570 = vmatpush3.bf16.msra.mxu0 %v660_v7  ;;  %609 = vmatprep.subr.bf16.mxu1 %v800_v1  ;;  %v684_v30 = vld [vmem:[#allocation8 + $0x10] sm:$0xff]   ;;  %v685_v31 = vld [vmem:[#allocation8 + $0x18] sm:$0xff]   ;;  %v687_v33 = vld [vmem:[#allocation8 + $0x28] sm:$0xff]  }
  0x57   :  { %571 = vmatprep.subr.bf16.mxu0 %v661_v8  ;;  %v526_v35 = vld [vmem:[%s941_s2] ss:$0 sm:$0xff]  ;;  %v688_v46 = vld [vmem:[#allocation8 + $0x30] sm:$0xff]   ;;  %v689_v47 = vld [vmem:[#allocation8 + $0x38] sm:$0xff]  }
  0x58   :  { %v545_v48 = vld [vmem:[%s943_s4] ss:$0 sm:$0xff] }
  0x59   :  { %610 = vmatpush3.bf16.msra.mxu1 %v676_v20  ;;  %v562_v58 = vld [vmem:[#allocation2] ss:$0 sm:$0xff] }
  0x5a   :  { %572 = vmatpush3.bf16.msra.mxu0 %v662_v9  ;;  %611 = vmatprep.subr.bf16.mxu1 %v800_v1 }
  0x5b   :  { %573 = vmatprep.subr.bf16.mxu0 %v663_v10 }
  0x5d   :  { %612 = vmatpush3.bf16.msra.mxu1 %v677_v22 }
  0x5e   :  { %574 = vmatpush3.bf16.msra.mxu0 %v664_v11  ;;  %613 = vmatprep.subr.bf16.mxu1 %v800_v1 }
  0x5f   :  { %575 = vmatprep.subr.bf16.mxu0 %v665_v12 }
  0x61   :  { %614 = vmatpush3.bf16.msra.mxu1 %v678_v24 }
  0x62   :  { %576 = vmatpush3.bf16.msra.mxu0 %v666_v13  ;;  %615 = vmatprep.subr.bf16.mxu1 %v800_v1 }
  0x63   :  { %577 = vmatprep.subr.bf16.mxu0 %v667_v16 }
  0x65   :  { %616 = vmatpush3.bf16.msra.mxu1 %v679_v25 }
  0x66   :  { %578 = vmatpush3.bf16.msra.mxu0 %v668_v18  ;;  %617 = vmatprep.subr.bf16.mxu1 %v800_v1 }
  0x67   :  { %579 = vmatprep.subr.bf16.mxu0 %v669_v19 }
  0x69   :  { %618 = vmatpush3.bf16.msra.mxu1 %v680_v26 }
  0x6a   :  { %580 = vmatpush3.bf16.msra.mxu0 %v670_v21  ;;  %619 = vmatprep.subr.bf16.mxu1 %v800_v1 }
  0x6b   :  { %625 = vmatprep.subr.bf16.mxu0 %v800_v1 }
  0x6d   :  { %264 = vmatmul.mubr.bf16.vlgmr.msra.gmra.mrb[0].mxu0 %v671_v23  ;;  %620 = vmatpush3.bf16.msra.mxu1 %v681_v27 }
  0x6e   :  { %641 = vmatprep.mubr.msk.bf16.mxu0 %vm801_vm0, %v800_v1  ;;  %626 = vmatpush3.bf16.msra.mxu0 %v682_v28 }
  0x6f   :  { %627 = vmatprep.subr.bf16.mxu0 %v800_v1 }
  0x72   :  { %628 = vmatpush3.bf16.msra.mxu0 %v683_v29 }
  0x73   :  { %629 = vmatprep.subr.bf16.mxu0 %v800_v1 }
  0x76   :  { %630 = vmatpush3.bf16.msra.mxu0 %v684_v30 }
  0x77   :  { %631 = vmatprep.subr.bf16.mxu0 %v800_v1 }
  0x7a   :  { %632 = vmatpush3.bf16.msra.mxu0 %v685_v31 }
  0x7b   :  { %633 = vmatprep.subr.bf16.mxu0 %v800_v1 }
  0x7e   :  { %634 = vmatpush3.bf16.msra.mxu0 %v686_v32 }
  0x7f   :  { %635 = vmatprep.subr.bf16.mxu0 %v800_v1 }
  0x82   :  { %636 = vmatpush3.bf16.msra.mxu0 %v687_v33 }
  0x83   :  { %637 = vmatprep.subr.bf16.mxu0 %v800_v1 }
  0x86   :  { %638 = vmatpush3.bf16.msra.mxu0 %v688_v46 }
  0x87   :  { %639 = vmatprep.subr.bf16.mxu0 %v800_v1 }
  0x8a   :  { %640 = vmatpush3.bf16.msra.mxu0 %v689_v47 }
 0x140   :  { %v581_v34 = vpop.f32.mrb[0].mxu0 }
 0x141   :  { %v582_v36 = vpop.f32.mrb[1].mxu0 }
 0x142   :  { %v583_v37 = vadd.f32 %v582_v36, %v581_v34  ;;  %v584_v38 = vpop.f32.mrb[2].mxu0 }
 0x143   :  { %v585_v39 = vpop.f32.mrb[3].mxu0 }
 0x144   :  { %v266_v40 = vadd.f32 %v583_v37, %v526_v35  ;;  %v586_v41 = vadd.f32 %v585_v39, %v584_v38 }
 0x146   :  { %v269_v42 = vadd.f32 %v586_v41, %v526_v35  ;;  %v272_v43 = vmax.f32 %v266_v40, 0.0 }
 0x148   :  { %v273_v44 = vmax.f32 %v269_v42, 0.0 }
 0x14a   :  { %v274_v45 = vpack.c.bf16 %v273_v44, %v272_v43 }
 0x14c   :  { %622 = vmatmul.mubr.bf16.vlgmr.msra.gmra.mrb[0].mxu1 %v274_v45 }
 0x21f   :  { %v380_v49 = vpop.f32.mrb[0].mxu1 }
 0x220   :  { %v381_v50 = vadd.f32 %v545_v48, %v380_v49  ;;  %v623_v51 = vpop.f32.mrb[1].mxu1 }
 0x221   :  { %v383_v52 = vpop.f32.mrb[2].mxu1 }
 0x222   :  { %v384_v53 = vadd.f32 %v545_v48, %v383_v52  ;;  %v624_v54 = vpop.f32.mrb[3].mxu1  ;;  %v387_v55 = vmax.f32 %v381_v50, 0.0 }
 0x224   :  { %v388_v56 = vmax.f32 %v384_v53, 0.0 }
 0x226   :  { %v389_v57 = vpack.c.bf16 %v388_v56, %v387_v55 }
 0x228   :  { %642 = vmatmul.mubr.bf16.vlgmr.msra.gmra.mrb[4].mxu0 %v389_v57 }
 0x2fb   :  { %v488_v59 = vpop.f32.mrb[4].mxu0 }
 0x2fc   :  { %v502_v60 = vadd.f32 %v562_v58, %v488_v59  ;;  %v643_v61 = vpop.f32.mrb[5].mxu0 }
 0x2fd   :  { %v491_v62 = vpop.f32.mrb[6].mxu0 }
 0x2fe   :  { %v563_v63 = vmul.f32 -1.442695, %v502_v60  ;;  %v503_v0 = vadd.f32 %v562_v58, %v491_v62  ;;  %v644_v1 = vpop.f32.mrb[7].mxu0 }
 0x300   :  { %690 = vpow2.f32 %v563_v63  ;;  %v564_v2 = vmul.f32 -1.442695, %v503_v0 }
 0x302   :  { %692 = vpow2.f32 %v564_v2 }
 0x30a   :  { %v691_v3 = vpop.eup %690 }
 0x30b   :  { %v510_v4 = vadd.f32 1.0, %v691_v3 }
 0x30c   :  { %v693_v5 = vpop.eup %692 }
 0x30d   :  { %694 = vrcp.f32 %v510_v4  ;;  %v511_v6 = vadd.f32 1.0, %v693_v5 }
 0x30f   :  { %696 = vrcp.f32 %v511_v6 }
 0x317   :  { %v695_v7 = vpop.eup %694 }
 0x318   :  { %517 = vst.msk [vmem:[%s946_s7] sm:$0xff] %vm516_vm1, %v695_v7 }
 0x319   :  { %v697_v8 = vpop.eup %696 }
 0x31a   :  { %518 = vst.msk [vmem:[%s946_s7 + $0x8] sm:$0xff] %vm516_vm1, %v697_v8 }
 0x31b   :  { %523 = vsyncpa [#allocation4], 1 }
 0x31c   :  { %524 = vsyncpa [#allocation6], 1 }
 0x31d   :  { %525 = vsyncpa [#allocation9], 1 }

</bundles_post_ra>
